<compile_context>
chip_gen: v5e
topology: v5e:2x2
jax: 0.10.0
libtpu: 0.0.40
codegen_flags: <defaults>
</compile_context>

<pallas_src>
import functools

import jax
import jax.numpy as jnp
from jax import lax
from jax.experimental import pallas as pl
from jax.experimental.pallas import tpu as pltpu


def _round_up(x, m):
    return ((x + m - 1) // m) * m


def _default_vmem_limit_bytes():
    """~75% of per-core VMEM, capped at 100 MiB; 48 MiB fallback (safe on v5e/v6e/v7x)."""
    try:
        cap = pltpu.get_tpu_info().vmem_capacity_bytes
        return int(min(100 * 1024 * 1024, int(cap * 0.75)))
    except Exception:  # no TPU info available at trace time
        return 48 * 1024 * 1024


def _retrieval_loss_kernel(q_ref, tr_ref, sqr_ref, kT_ref, tk_ref, sqk_ref,
                           loss_ref,
                           m_pos_ref, m_neg_ref, d2p_ref, d2n_ref,
                           *, delta, n_valid, block_cols):
    # q_ref   (TB, D)   row tile of queries (f32 or bf16)
    # tr_ref  (TB, 1)   i32 labels of the row tile
    # sqr_ref (TB, 1)   f32 |q_i|^2 of the row tile          (streamed, not recomputed)
    # kT_ref  (D,  TN)  key tile, transposed (f32 or bf16)
    # tk_ref  (1,  TN)  i32 labels of the key tile
    # sqk_ref (1,  TN)  f32 |q_j|^2 of the key tile
    # loss_ref(TB, 1)   f32 per-row hinge loss (resident across k, written at k==last)
    # scratch: running online-argmax state, (TB, 1) f32 each
    kk = pl.program_id(1)

    @pl.when(kk == 0)
    def _init():
        neg_inf = jnp.full(m_pos_ref.shape, -jnp.inf, jnp.float32)
        m_pos_ref[...] = neg_inf
        m_neg_ref[...] = neg_inf
        d2p_ref[...] = jnp.zeros(d2p_ref.shape, jnp.float32)
        d2n_ref[...] = jnp.zeros(d2n_ref.shape, jnp.float32)

    # One MXU matmul per (row tile, key tile). f32 accumulation always.
    g = jnp.dot(q_ref[...], kT_ref[...], preferred_element_type=jnp.float32)   # (TB, TN)

    sq_row = sqr_ref[...]                                   # (TB, 1)
    sq_key = sqk_ref[...]                                   # (1,  TN)

    # torch dist(a, a) with l2(b) broadcasting as a column: -2*g + 2*|q_i|^2
    distances = 2.0 * sq_row - 2.0 * g                      # (TB, TN)
    # true squared distance used by the loss: |q_i - q_j|^2 = distances + (|q_j|^2-|q_i|^2)
    d2 = distances + (sq_key - sq_row)                      # (TB, TN)

    same = tr_ref[...] == tk_ref[...]                       # (TB, TN) bool (broadcast)
    col = lax.broadcasted_iota(jnp.int32, (1, block_cols), 1)
    # columns >= n_valid are key-side padding; they must never win an argmax
    valid = (col + kk * block_cols) < n_valid               # (1, TN) bool

    masked_valid = distances * valid.astype(jnp.float32)    # exact 0 on padded columns
    masked_pos = masked_valid * same.astype(jnp.float32)    # == torch distances * same
    masked_neg = masked_valid - masked_pos                  # == torch distances * ~same

    def first_argmax_select(m):
        # value of the row max + d2 at the FIRST maximal column of this tile
        # (matches torch.argmax tie rule; int32 iota keeps the tie-break exact).
        row_max = jnp.max(m, axis=-1, keepdims=True)                         # (TB, 1)
        is_max = m == row_max
        idx = jnp.min(jnp.where(is_max, col, block_cols), axis=-1, keepdims=True)
        d2_sel = jnp.sum(jnp.where(col == idx, d2, 0.0), axis=-1, keepdims=True)
        return row_max, d2_sel

    tile_pmax, tile_pd2 = first_argmax_select(masked_pos)
    tile_nmax, tile_nd2 = first_argmax_select(masked_neg)

    # Online combine across key tiles: strictly-greater updates preserve the global
    # first-argmax (earlier tiles hold earlier column indices, so ties keep the old state).
    upd_p = tile_pmax > m_pos_ref[...]
    d2p_ref[...] = jnp.where(upd_p, tile_pd2, d2p_ref[...])
    m_pos_ref[...] = jnp.where(upd_p, tile_pmax, m_pos_ref[...])

    upd_n = tile_nmax > m_neg_ref[...]
    d2n_ref[...] = jnp.where(upd_n, tile_nd2, d2n_ref[...])
    m_neg_ref[...] = jnp.where(upd_n, tile_nmax, m_neg_ref[...])

    @pl.when(kk == pl.num_programs(1) - 1)
    def _finalize():
        loss_ref[...] = jnp.maximum(delta - d2p_ref[...] + d2n_ref[...], 0.0)


def retrieval_loss(queries, targets, *, delta=1.0,
                   block_rows=256, block_cols=512, use_bf16=False):
    """Pallas-backed RetrievalLoss.forward(queries, targets) -> scalar.

    block_rows/block_cols default to a v6e/v7x-friendly tiling; pass 128/128 (or smaller)
    when targeting v5e's tighter scoped VMEM and 128-wide MXU.
    use_bf16 feeds the MXU bf16 operands (faster, half the key DMA) at the cost of
    possible argmax flips on near-ties; default keeps exact f32 selection semantics.
    """
    queries = jnp.asarray(queries, jnp.float32)
    targets = jnp.asarray(targets, jnp.int32)
    n, d = queries.shape

    # --- row (query) tiling: >=2 tiles whenever possible so v7x's two TCs both get work.
    tb = _round_up(min(block_rows, max(8, _round_up((n + 1) // 2, 8))), 8)
    num_row_tiles = pl.cdiv(n, tb)
    n_pad_r = num_row_tiles * tb

    # --- key (column) tiling: TN multiple of 128, keys padded to a multiple of TN.
    tn = _round_up(min(block_cols, _round_up(n, 128)), 128)
    n_pad_k = _round_up(n, tn)
    num_key_tiles = n_pad_k // tn

    sq = jnp.sum(queries * queries, axis=-1)                         # (N,) f32

    pad_r = n_pad_r - n
    pad_k = n_pad_k - n
    op_dtype = jnp.bfloat16 if use_bf16 else jnp.float32

    q_rows = jnp.pad(queries, ((0, pad_r), (0, 0))) if pad_r else queries
    q_rows = q_rows.astype(op_dtype)                                  # (Nr, D)
    t_rows = (jnp.pad(targets, (0, pad_r)) if pad_r else targets)[:, None]      # (Nr, 1)
    sq_rows = (jnp.pad(sq, (0, pad_r)) if pad_r else sq)[:, None]               # (Nr, 1)

    keys = jnp.pad(queries, ((0, pad_k), (0, 0))) if pad_k else queries
    keys_T = keys.T.astype(op_dtype)                                  # (D, Nk)
    t_keys = (jnp.pad(targets, (0, pad_k)) if pad_k else targets)[None, :]      # (1, Nk)
    sq_keys = (jnp.pad(sq, (0, pad_k)) if pad_k else sq)[None, :]               # (1, Nk)

    kernel = functools.partial(_retrieval_loss_kernel,
                               delta=float(delta), n_valid=int(n), block_cols=int(tn))

    per_row = pl.pallas_call(
        kernel,
        out_shape=jax.ShapeDtypeStruct((n_pad_r, 1), jnp.float32),
        grid_spec=pltpu.PrefetchScalarGridSpec(
            num_scalar_prefetch=0,
            grid=(num_row_tiles, num_key_tiles),
            in_specs=[
                pl.BlockSpec((tb, d), lambda i, k: (i, 0)),    # query row tile
                pl.BlockSpec((tb, 1), lambda i, k: (i, 0)),    # row labels
                pl.BlockSpec((tb, 1), lambda i, k: (i, 0)),    # row squared norms
                pl.BlockSpec((d, tn), lambda i, k: (0, k)),    # key tile (streams over k)
                pl.BlockSpec((1, tn), lambda i, k: (0, k)),    # key labels
                pl.BlockSpec((1, tn), lambda i, k: (0, k)),    # key squared norms
            ],
            out_specs=pl.BlockSpec((tb, 1), lambda i, k: (i, 0)),   # resident across k
            scratch_shapes=[
                pltpu.VMEM((tb, 1), jnp.float32),   # running max (pos)
                pltpu.VMEM((tb, 1), jnp.float32),   # running max (neg)
                pltpu.VMEM((tb, 1), jnp.float32),   # selected d2 (pos)
                pltpu.VMEM((tb, 1), jnp.float32),   # selected d2 (neg)
            ],
        ),
        compiler_params=pltpu.CompilerParams(
            dimension_semantics=("parallel", "arbitrary"),
            vmem_limit_bytes=_default_vmem_limit_bytes(),
        ),
    )(q_rows, t_rows, sq_rows, keys_T, t_keys, sq_keys)

    # Final mean over the N valid rows (trivial reduction, done in plain JAX).
    return jnp.mean(per_row[:n, 0])


def retrieval_loss_reference(queries, targets, delta=1.0):
    """Plain-JAX replica of the PyTorch module (incl. its column-broadcast of l2(b))."""
    queries = jnp.asarray(queries, jnp.float32)
    targets = jnp.asarray(targets, jnp.int32)
    sq = jnp.sum(queries ** 2, axis=-1, keepdims=True)
    g = jnp.dot(queries, queries.T, precision=lax.Precision.HIGHEST)
    distances = -2.0 * g + sq + sq
    same = targets[:, None] == targets[None, :]
    pos = queries[jnp.argmax(distances * same, axis=-1)]
    neg = queries[jnp.argmax(distances * (~same), axis=-1)]
    loss = (delta
            - jnp.sum((queries - pos) ** 2, axis=-1)
            + jnp.sum((queries - neg) ** 2, axis=-1))
    return jnp.mean(jnp.maximum(loss, 0.0))


if __name__ == "__main__":
    key = jax.random.PRNGKey(0)
    k1, k2, k3 = jax.random.split(key, 3)

    # Test 1: small case — 2 parallel row tiles, single key tile.
    n, d, n_classes = 16, 128, 4
    q1 = jax.random.normal(k1, (n, d), jnp.float32)
    t1 = jax.random.permutation(k2, jnp.arange(n, dtype=jnp.int32) % n_classes)
    out1 = retrieval_loss(q1, t1, delta=1.0)
    jax.block_until_ready(out1)
    ref1 = retrieval_loss_reference(q1, t1, delta=1.0)
    assert out1.shape == ()
    assert jnp.allclose(out1, ref1, atol=2e-3, rtol=2e-3), (out1, ref1)

    # Test 2: exercises key-dimension tiling (3 key tiles) plus row- and key-side padding.
    n2, d2, n_classes2 = 272, 128, 7
    q2 = jax.random.normal(k3, (n2, d2), jnp.float32)
    t2 = jnp.arange(n2, dtype=jnp.int32) % n_classes2
    out2 = retrieval_loss(q2, t2, delta=1.0, block_rows=128, block_cols=128)
    jax.block_until_ready(out2)
    ref2 = retrieval_loss_reference(q2, t2, delta=1.0)
    assert jnp.allclose(out2, ref2, atol=2e-3, rtol=2e-3), (out2, ref2)

    print("KERNEL_OK")
</pallas_src>

<mosaic_0001>
module attributes {stable_mosaic.version = 11 : i64} {
  func.func @_retrieval_loss_kernel(%arg0: i32, %arg1: i32, %arg2: memref<8x128xf32, #tpu.memory_space<vmem>>, %arg3: memref<8x1xi32, #tpu.memory_space<vmem>>, %arg4: memref<8x1xf32, #tpu.memory_space<vmem>>, %arg5: memref<128x128xf32, #tpu.memory_space<vmem>>, %arg6: memref<1x128xi32, #tpu.memory_space<vmem>>, %arg7: memref<1x128xf32, #tpu.memory_space<vmem>>, %arg8: memref<8x1xf32, #tpu.memory_space<vmem>>, %arg9: memref<8x1xf32, #tpu.memory_space<vmem>>, %arg10: memref<8x1xf32, #tpu.memory_space<vmem>>, %arg11: memref<8x1xf32, #tpu.memory_space<vmem>>, %arg12: memref<8x1xf32, #tpu.memory_space<vmem>>) attributes {dimension_semantics = [#tpu.dimension_semantics<parallel>, #tpu.dimension_semantics<arbitrary>], iteration_bounds = array<i64: 2, 1>, scalar_prefetch = 0 : i64, scratch_operands = 4 : i64, tpu.core_type = #tpu.core_type<tc>, window_params = [{transform_indices = @transform_0, window_bounds = array<i64: 8, 128>}, {transform_indices = @transform_1, window_bounds = array<i64: 8, 1>}, {transform_indices = @transform_2, window_bounds = array<i64: 8, 1>}, {transform_indices = @transform_3, window_bounds = array<i64: 128, 128>}, {transform_indices = @transform_4, window_bounds = array<i64: 1, 128>}, {transform_indices = @transform_5, window_bounds = array<i64: 1, 128>}, {transform_indices = @transform_6, window_bounds = array<i64: 8, 1>}]} {
    %c0_i32 = arith.constant 0 : i32
    %0 = arith.cmpi eq, %arg1, %c0_i32 : i32
    %1 = arith.extui %0 : i1 to i32
    %c0_i32_0 = arith.constant 0 : i32
    %2 = arith.cmpi ne, %1, %c0_i32_0 : i32
    scf.if %2 {
      %cst_46 = arith.constant 0xFF800000 : f32
      %90 = vector.broadcast %cst_46 : f32 to vector<8x1xf32>
      %c0_47 = arith.constant 0 : index
      %c0_48 = arith.constant 0 : index
      %91 = vector.load %arg9[%c0_47, %c0_48] : memref<8x1xf32, #tpu.memory_space<vmem>>, vector<8x1xf32>
      tpu.vector_store %arg9[%c0_47, %c0_48], %90 {strides = array<i32>} : memref<8x1xf32, #tpu.memory_space<vmem>>, vector<8x1xf32>,
      %c0_49 = arith.constant 0 : index
      %c0_50 = arith.constant 0 : index
      %92 = vector.load %arg10[%c0_49, %c0_50] : memref<8x1xf32, #tpu.memory_space<vmem>>, vector<8x1xf32>
      tpu.vector_store %arg10[%c0_49, %c0_50], %90 {strides = array<i32>} : memref<8x1xf32, #tpu.memory_space<vmem>>, vector<8x1xf32>,
      %cst_51 = arith.constant 0.000000e+00 : f32
      %93 = vector.broadcast %cst_51 : f32 to vector<8x1xf32>
      %c0_52 = arith.constant 0 : index
      %c0_53 = arith.constant 0 : index
      %94 = vector.load %arg11[%c0_52, %c0_53] : memref<8x1xf32, #tpu.memory_space<vmem>>, vector<8x1xf32>
      tpu.vector_store %arg11[%c0_52, %c0_53], %93 {strides = array<i32>} : memref<8x1xf32, #tpu.memory_space<vmem>>, vector<8x1xf32>,
      %cst_54 = arith.constant 0.000000e+00 : f32
      %95 = vector.broadcast %cst_54 : f32 to vector<8x1xf32>
      %c0_55 = arith.constant 0 : index
      %c0_56 = arith.constant 0 : index
      %96 = vector.load %arg12[%c0_55, %c0_56] : memref<8x1xf32, #tpu.memory_space<vmem>>, vector<8x1xf32>
      tpu.vector_store %arg12[%c0_55, %c0_56], %95 {strides = array<i32>} : memref<8x1xf32, #tpu.memory_space<vmem>>, vector<8x1xf32>,
    } else {
    }
    %c0 = arith.constant 0 : index
    %c0_1 = arith.constant 0 : index
    %3 = vector.load %arg2[%c0, %c0_1] : memref<8x128xf32, #tpu.memory_space<vmem>>, vector<8x128xf32>
    %c0_2 = arith.constant 0 : index
    %c0_3 = arith.constant 0 : index
    %4 = vector.load %arg5[%c0_2, %c0_3] : memref<128x128xf32, #tpu.memory_space<vmem>>, vector<128x128xf32>
    %cst = arith.constant dense<0.000000e+00> : vector<8x128xf32>
    %5 = tpu.matmul %3, %4, %cst {dimension_numbers = #tpu.dot_dimension_numbers<[1], [0], [0], [1], [0, 0, 1, 1], [], []>} : vector<8x128xf32>, vector<128x128xf32>, vector<8x128xf32> -> vector<8x128xf32>
    %c0_4 = arith.constant 0 : index
    %c0_5 = arith.constant 0 : index
    %6 = vector.load %arg4[%c0_4, %c0_5] : memref<8x1xf32, #tpu.memory_space<vmem>>, vector<8x1xf32>
    %c0_6 = arith.constant 0 : index
    %c0_7 = arith.constant 0 : index
    %7 = vector.load %arg7[%c0_6, %c0_7] : memref<1x128xf32, #tpu.memory_space<vmem>>, vector<1x128xf32>
    %cst_8 = arith.constant 2.000000e+00 : f32
    %8 = vector.broadcast %cst_8 : f32 to vector<8x1xf32>
    %9 = arith.mulf %8, %6 : vector<8x1xf32>
    %cst_9 = arith.constant 2.000000e+00 : f32
    %10 = vector.broadcast %cst_9 : f32 to vector<8x128xf32>
    %11 = arith.mulf %10, %5 : vector<8x128xf32>
    %12 = vector.broadcast %9 : vector<8x1xf32> to vector<8x128xf32>
    %13 = arith.subf %12, %11 : vector<8x128xf32>
    %14 = vector.broadcast %7 : vector<1x128xf32> to vector<8x128xf32>
    %15 = vector.broadcast %6 : vector<8x1xf32> to vector<8x128xf32>
    %16 = arith.subf %14, %15 : vector<8x128xf32>
    %17 = arith.addf %13, %16 : vector<8x128xf32>
    %c0_10 = arith.constant 0 : index
    %c0_11 = arith.constant 0 : index
    %18 = vector.load %arg3[%c0_10, %c0_11] : memref<8x1xi32, #tpu.memory_space<vmem>>, vector<8x1xi32>
    %c0_12 = arith.constant 0 : index
    %c0_13 = arith.constant 0 : index
    %19 = vector.load %arg6[%c0_12, %c0_13] : memref<1x128xi32, #tpu.memory_space<vmem>>, vector<1x128xi32>
    %20 = vector.broadcast %18 : vector<8x1xi32> to vector<8x128xi32>
    %21 = vector.broadcast %19 : vector<1x128xi32> to vector<8x128xi32>
    %22 = arith.cmpi eq, %20, %21 : vector<8x128xi32>
    %23 = tpu.iota {dimensions = array<i32: 1>} : vector<1x128xi32>
    %c128_i32 = arith.constant 128 : i32
    %24 = arith.muli %arg1, %c128_i32 : i32
    %25 = vector.broadcast %24 : i32 to vector<1x128xi32>
    %26 = arith.addi %23, %25 : vector<1x128xi32>
    %c16_i32 = arith.constant 16 : i32
    %27 = vector.broadcast %c16_i32 : i32 to vector<1x128xi32>
    %28 = arith.cmpi slt, %26, %27 : vector<1x128xi32>
    %29 = arith.extui %28 : vector<1x128xi1> to vector<1x128xi32>
    %30 = arith.sitofp %29 : vector<1x128xi32> to vector<1x128xf32>
    %31 = vector.broadcast %30 : vector<1x128xf32> to vector<8x128xf32>
    %32 = arith.mulf %13, %31 : vector<8x128xf32>
    %33 = arith.extui %22 : vector<8x128xi1> to vector<8x128xi32>
    %34 = arith.sitofp %33 : vector<8x128xi32> to vector<8x128xf32>
    %35 = arith.mulf %32, %34 : vector<8x128xf32>
    %36 = arith.subf %32, %35 : vector<8x128xf32>
    %cst_14 = arith.constant dense<0xFF800000> : vector<8xf32>
    %37 = vector.multi_reduction <maximumf>, %35, %cst_14 [1] : vector<8x128xf32> to vector<8xf32>
    %38 = vector.shape_cast %37 : vector<8xf32> to vector<8x1xf32>
    %39 = vector.broadcast %38 : vector<8x1xf32> to vector<8x128xf32>
    %40 = arith.cmpf oeq, %35, %39 : vector<8x128xf32>
    %c128_i32_15 = arith.constant 128 : i32
    %41 = vector.shape_cast %23 : vector<1x128xi32> to vector<1x128xi32>
    %42 = vector.broadcast %41 : vector<1x128xi32> to vector<8x128xi32>
    %43 = vector.broadcast %c128_i32_15 : i32 to vector<8x128xi32>
    %44 = arith.select %40, %42, %43 : vector<8x128xi1>, vector<8x128xi32>
    %cst_16 = arith.constant dense<2147483647> : vector<8xi32>
    %45 = vector.multi_reduction <minsi>, %44, %cst_16 [1] : vector<8x128xi32> to vector<8xi32>
    %46 = vector.shape_cast %45 : vector<8xi32> to vector<8x1xi32>
    %47 = vector.broadcast %23 : vector<1x128xi32> to vector<8x128xi32>
    %48 = vector.broadcast %46 : vector<8x1xi32> to vector<8x128xi32>
    %49 = arith.cmpi eq, %47, %48 : vector<8x128xi32>
    %cst_17 = arith.constant 0.000000e+00 : f32
    %50 = vector.broadcast %cst_17 : f32 to vector<8x128xf32>
    %51 = arith.select %49, %17, %50 : vector<8x128xi1>, vector<8x128xf32>
    %cst_18 = arith.constant dense<0.000000e+00> : vector<8xf32>
    %52 = vector.multi_reduction <add>, %51, %cst_18 [1] : vector<8x128xf32> to vector<8xf32>
    %53 = vector.shape_cast %52 : vector<8xf32> to vector<8x1xf32>
    %cst_19 = arith.constant dense<0xFF800000> : vector<8xf32>
    %54 = vector.multi_reduction <maximumf>, %36, %cst_19 [1] : vector<8x128xf32> to vector<8xf32>
    %55 = vector.shape_cast %54 : vector<8xf32> to vector<8x1xf32>
    %56 = vector.broadcast %55 : vector<8x1xf32> to vector<8x128xf32>
    %57 = arith.cmpf oeq, %36, %56 : vector<8x128xf32>
    %c128_i32_20 = arith.constant 128 : i32
    %58 = vector.shape_cast %23 : vector<1x128xi32> to vector<1x128xi32>
    %59 = vector.broadcast %58 : vector<1x128xi32> to vector<8x128xi32>
    %60 = vector.broadcast %c128_i32_20 : i32 to vector<8x128xi32>
    %61 = arith.select %57, %59, %60 : vector<8x128xi1>, vector<8x128xi32>
    %cst_21 = arith.constant dense<2147483647> : vector<8xi32>
    %62 = vector.multi_reduction <minsi>, %61, %cst_21 [1] : vector<8x128xi32> to vector<8xi32>
    %63 = vector.shape_cast %62 : vector<8xi32> to vector<8x1xi32>
    %64 = vector.broadcast %23 : vector<1x128xi32> to vector<8x128xi32>
    %65 = vector.broadcast %63 : vector<8x1xi32> to vector<8x128xi32>
    %66 = arith.cmpi eq, %64, %65 : vector<8x128xi32>
    %cst_22 = arith.constant 0.000000e+00 : f32
    %67 = vector.broadcast %cst_22 : f32 to vector<8x128xf32>
    %68 = arith.select %66, %17, %67 : vector<8x128xi1>, vector<8x128xf32>
    %cst_23 = arith.constant dense<0.000000e+00> : vector<8xf32>
    %69 = vector.multi_reduction <add>, %68, %cst_23 [1] : vector<8x128xf32> to vector<8xf32>
    %70 = vector.shape_cast %69 : vector<8xf32> to vector<8x1xf32>
    %c0_24 = arith.constant 0 : index
    %c0_25 = arith.constant 0 : index
    %71 = vector.load %arg9[%c0_24, %c0_25] : memref<8x1xf32, #tpu.memory_space<vmem>>, vector<8x1xf32>
    %72 = arith.cmpf ogt, %38, %71 : vector<8x1xf32>
    %c0_26 = arith.constant 0 : index
    %c0_27 = arith.constant 0 : index
    %73 = vector.load %arg11[%c0_26, %c0_27] : memref<8x1xf32, #tpu.memory_space<vmem>>, vector<8x1xf32>
    %74 = arith.select %72, %53, %73 : vector<8x1xi1>, vector<8x1xf32>
    %c0_28 = arith.constant 0 : index
    %c0_29 = arith.constant 0 : index
    %75 = vector.load %arg11[%c0_28, %c0_29] : memref<8x1xf32, #tpu.memory_space<vmem>>, vector<8x1xf32>
    tpu.vector_store %arg11[%c0_28, %c0_29], %74 {strides = array<i32>} : memref<8x1xf32, #tpu.memory_space<vmem>>, vector<8x1xf32>,
    %c0_30 = arith.constant 0 : index
    %c0_31 = arith.constant 0 : index
    %76 = vector.load %arg9[%c0_30, %c0_31] : memref<8x1xf32, #tpu.memory_space<vmem>>, vector<8x1xf32>
    %77 = arith.select %72, %38, %76 : vector<8x1xi1>, vector<8x1xf32>
    %c0_32 = arith.constant 0 : index
    %c0_33 = arith.constant 0 : index
    %78 = vector.load %arg9[%c0_32, %c0_33] : memref<8x1xf32, #tpu.memory_space<vmem>>, vector<8x1xf32>
    tpu.vector_store %arg9[%c0_32, %c0_33], %77 {strides = array<i32>} : memref<8x1xf32, #tpu.memory_space<vmem>>, vector<8x1xf32>,
    %c0_34 = arith.constant 0 : index
    %c0_35 = arith.constant 0 : index
    %79 = vector.load %arg10[%c0_34, %c0_35] : memref<8x1xf32, #tpu.memory_space<vmem>>, vector<8x1xf32>
    %80 = arith.cmpf ogt, %55, %79 : vector<8x1xf32>
    %c0_36 = arith.constant 0 : index
    %c0_37 = arith.constant 0 : index
    %81 = vector.load %arg12[%c0_36, %c0_37] : memref<8x1xf32, #tpu.memory_space<vmem>>, vector<8x1xf32>
    %82 = arith.select %80, %70, %81 : vector<8x1xi1>, vector<8x1xf32>
    %c0_38 = arith.constant 0 : index
    %c0_39 = arith.constant 0 : index
    %83 = vector.load %arg12[%c0_38, %c0_39] : memref<8x1xf32, #tpu.memory_space<vmem>>, vector<8x1xf32>
    tpu.vector_store %arg12[%c0_38, %c0_39], %82 {strides = array<i32>} : memref<8x1xf32, #tpu.memory_space<vmem>>, vector<8x1xf32>,
    %c0_40 = arith.constant 0 : index
    %c0_41 = arith.constant 0 : index
    %84 = vector.load %arg10[%c0_40, %c0_41] : memref<8x1xf32, #tpu.memory_space<vmem>>, vector<8x1xf32>
    %85 = arith.select %80, %55, %84 : vector<8x1xi1>, vector<8x1xf32>
    %c0_42 = arith.constant 0 : index
    %c0_43 = arith.constant 0 : index
    %86 = vector.load %arg10[%c0_42, %c0_43] : memref<8x1xf32, #tpu.memory_space<vmem>>, vector<8x1xf32>
    tpu.vector_store %arg10[%c0_42, %c0_43], %85 {strides = array<i32>} : memref<8x1xf32, #tpu.memory_space<vmem>>, vector<8x1xf32>,
    %c0_i32_44 = arith.constant 0 : i32
    %87 = arith.cmpi eq, %arg1, %c0_i32_44 : i32
    %88 = arith.extui %87 : i1 to i32
    %c0_i32_45 = arith.constant 0 : i32
    %89 = arith.cmpi ne, %88, %c0_i32_45 : i32
    scf.if %89 {
      %c0_46 = arith.constant 0 : index
      %c0_47 = arith.constant 0 : index
      %90 = vector.load %arg11[%c0_46, %c0_47] : memref<8x1xf32, #tpu.memory_space<vmem>>, vector<8x1xf32>
      %cst_48 = arith.constant 1.000000e+00 : f32
      %91 = vector.broadcast %cst_48 : f32 to vector<8x1xf32>
      %92 = arith.subf %91, %90 : vector<8x1xf32>
      %c0_49 = arith.constant 0 : index
      %c0_50 = arith.constant 0 : index
      %93 = vector.load %arg12[%c0_49, %c0_50] : memref<8x1xf32, #tpu.memory_space<vmem>>, vector<8x1xf32>
      %94 = arith.addf %92, %93 : vector<8x1xf32>
      %cst_51 = arith.constant 0.000000e+00 : f32
      %95 = vector.broadcast %cst_51 : f32 to vector<8x1xf32>
      %96 = arith.maximumf %94, %95 : vector<8x1xf32>
      %c0_52 = arith.constant 0 : index
      %c0_53 = arith.constant 0 : index
      %97 = vector.load %arg8[%c0_52, %c0_53] : memref<8x1xf32, #tpu.memory_space<vmem>>, vector<8x1xf32>
      tpu.vector_store %arg8[%c0_52, %c0_53], %96 {strides = array<i32>} : memref<8x1xf32, #tpu.memory_space<vmem>>, vector<8x1xf32>,
    } else {
    }
    return
  }
  func.func @transform_0(%arg0: i32, %arg1: i32) -> (i32, i32) {
    %c0_i32 = arith.constant 0 : i32
    %c0_i32_0 = arith.constant 0 : i32
    return %arg0, %c0_i32 : i32, i32
  }
  func.func @transform_1(%arg0: i32, %arg1: i32) -> (i32, i32) {
    %c0_i32 = arith.constant 0 : i32
    %c0_i32_0 = arith.constant 0 : i32
    return %arg0, %c0_i32 : i32, i32
  }
  func.func @transform_2(%arg0: i32, %arg1: i32) -> (i32, i32) {
    %c0_i32 = arith.constant 0 : i32
    %c0_i32_0 = arith.constant 0 : i32
    return %arg0, %c0_i32 : i32, i32
  }
  func.func @transform_3(%arg0: i32, %arg1: i32) -> (i32, i32) {
    %c0_i32 = arith.constant 0 : i32
    %c0_i32_0 = arith.constant 0 : i32
    return %c0_i32, %arg1 : i32, i32
  }
  func.func @transform_4(%arg0: i32, %arg1: i32) -> (i32, i32) {
    %c0_i32 = arith.constant 0 : i32
    %c0_i32_0 = arith.constant 0 : i32
    return %c0_i32, %arg1 : i32, i32
  }
  func.func @transform_5(%arg0: i32, %arg1: i32) -> (i32, i32) {
    %c0_i32 = arith.constant 0 : i32
    %c0_i32_0 = arith.constant 0 : i32
    return %c0_i32, %arg1 : i32, i32
  }
  func.func @transform_6(%arg0: i32, %arg1: i32) -> (i32, i32) {
    %c0_i32 = arith.constant 0 : i32
    %c0_i32_0 = arith.constant 0 : i32
    return %arg0, %c0_i32 : i32, i32
  }
}

</mosaic_0001>

<bundles_post_ra>
// kernel: tpu_custom_call.1
= control target key start
LH: loop header
LB: loop body
LE: loop exit
PB: predicated region body
PF: predicated region fallthrough
CT: control target
= control target key end

     0   :  { %11 = vsyncpa [#allocation7], 0  ;;  %s785_s21 = smov 0   ;;  %s787_s22 = smov 0   ;;  %s860_s0 = inlined_call_operand.vmem [shape: f32[16,128], index: 0, kind: input, shape index: {}]   ;;  %s861_s1 = inlined_call_operand.vmem [shape: s32[16,1], index: 1, kind: input, shape index: {}]   ;;  %s862_s2 = inlined_call_operand.vmem [shape: f32[16,1], index: 2, kind: input, shape index: {}]   ;;  %s863_s3 = inlined_call_operand.hbm [shape: f32[128,128], index: 3, kind: input, shape index: {}]   ;;  %s864_s4 = inlined_call_operand.vmem [shape: s32[1,128], index: 4, kind: input, shape index: {}]   ;;  %s865_s5 = inlined_call_operand.vmem [shape: f32[1,128], index: 5, kind: input, shape index: {}]   ;;  %s866_s6 = inlined_call_operand.vmem [shape: f32[16,1], index: 6, kind: output, shape index: {}]  }
   0x1   :  { %s789_s23 = smov 0  }
   0x2 LB: > { %s625_s24 = sadd.s32 4294967295, %s742_s23   ;;  %s29_s25 = sadd.s32 1, %s738_s22  ;;  %s742_s23 = sphi %s789_s23, %s17_s23   ;;  %s738_s22 = sphi %s787_s22, %s868_s22   ;;  %s734_s21 = sphi %s785_s21, %s867_s21  }
   0x3   : > { %p31_p0 = scmp.ge.s32.totalorder %s29_s25, 2  ;;  %p627_p1 = scmp.ge.s32.totalorder %s742_s23, 1 }
   0x4   : > { %p216_p2 = scmp.lt.s32.totalorder %s742_s23, 3  ;;  %p650_p4 = scmp.eq.s32.totalorder %s625_s24, 0 }
   0x5   : > { %s870_s25 = smov (%p31_p0, %s29_s25), 0  ;;  %s229_s28 = sshll.u32 %s863_s3, 4  ;;  %s230_s28 = int_to_ptr.hbm [resolvable:$true] %s229_s28 }
   0x6   : > { %p217_p3 = pnand %p627_p1, %p216_p2  ;;  %s744_s29 = smov [#allocation6]  }
   0x7   : > { %s231_s30 = sshll.u32 %s744_s29, 4  ;;  %s745_s7 = smov 128   ;;  %s232_s30 = int_to_ptr.vmem [resolvable:$true] %s231_s30 }
   0x8   : > { %p646_p5 = pneg %p217_p3  ;;  %s746_s8 = smov 8  }
   0x9   : > { %280 = sbr.rel (%p217_p3) target bundleno = 682 (0x2aa), region = 44 }
   0xa   : > { %p647_p6 = pnand %p650_p4, %p646_p5 }
   0xc   : > { %649 = dma.hbm_to_vmem [thread:$0]  (!%p647_p6), %s230_s28, 2048, %s232_s30, [#allocation7], %s745_s7, %s745_s7, %s746_s8  }
   0xe   : > { %729 = dma.done.wait (%p650_p4), [#allocation7], 2048  }
   0xf   : > { %731 = vsyncadd (%p650_p4), [#allocation7], 4294965248  ;;  %p323_p7 = scmp.lt.s32.totalorder %s734_s21, 1  ;;  %v747_v0 = vmov 0   ;;  %v370_v1 = vld [vmem:[#allocation6 + $0x78] sm:$0xff]  ;;  %v369_v2 = vld [vmem:[#allocation6 + $0x70] sm:$0xff]  ;;  %v418_v23 = vlaneseq }
  0x10   : > { %682 = vset.pattern.permute.xlu0 %v747_v0  ;;  %683 = vset.pattern.permute.xlu1 %v747_v0  ;;  %v368_v3 = vld [vmem:[#allocation6 + $0x68] sm:$0xff]  ;;  %v367_v4 = vld [vmem:[#allocation6 + $0x60] sm:$0xff]  ;;  %v366_v6 = vld [vmem:[#allocation6 + $0x58] sm:$0xff]  ;;  %vm349_vm0 = vcmask 7168   ;;  %v748_v21 = vmov 0.0   ;;  %v749_v34 = vmov -inf  }
  0x11   : > { %s872_s21 = smov (!%p323_p7, %s734_s21), 1  ;;  %371 = vmatpush.msra.mxu0 %v370_v1  ;;  %v365_v8 = vld [vmem:[#allocation6 + $0x50] sm:$0xff]  ;;  %v364_v9 = vld [vmem:[#allocation6 + $0x48] sm:$0xff]  ;;  %v363_v10 = vld [vmem:[#allocation6 + $0x40] sm:$0xff]  ;;  %352 = vst.msk [vmem:[#allocation4] sm:$0xff] %vm349_vm0, %v748_v21  ;;  %v823_v24 = vand.u32 127, %v418_v23 }
  0x12   : > { %s807_s9 = sshll.u32 %s872_s21, 3  ;;  %v362_v12 = vld [vmem:[#allocation6 + $0x38] sm:$0xff]  ;;  %v361_v13 = vld [vmem:[#allocation6 + $0x30] sm:$0xff]  ;;  %v360_v14 = vld [vmem:[#allocation6 + $0x28] sm:$0xff]  ;;  %353 = vst.msk [vmem:[#allocation5] sm:$0xff] %vm349_vm0, %v748_v21 }
  0x13   : > { %s334_s12 = scalar_lea.vmem %s862_s2, %s807_s9  ;;  %372 = vmatpush.msra.mxu0 %v369_v2  ;;  %s330_s15 = scalar_lea.vmem %s861_s1, %s807_s9  ;;  %v359_v15 = vld [vmem:[#allocation6 + $0x20] sm:$0xff]  ;;  %v358_v16 = vld [vmem:[#allocation6 + $0x18] sm:$0xff]  ;;  %v357_v17 = vld [vmem:[#allocation6 + $0x10] sm:$0xff]  ;;  %vm423_vm1 = vcmp.lt.s32.totalorder %v823_v24, 16  ;;  %350 = vst.msk [vmem:[#allocation2] sm:$0xff] %vm349_vm0, %v749_v34 }
  0x14   : > { %v391_v5 = vld [vmem:[%s334_s12] sm:$0xff]  ;;  %v356_v18 = vld [vmem:[#allocation6 + $0x8] sm:$0xff]  ;;  %s326_s18 = scalar_lea.vmem %s860_s0, %s807_s9  ;;  %v638_v29 = vsel %vm423_vm1, 1.0, %v748_v21  ;;  %351 = vst.msk [vmem:[#allocation3] sm:$0xff] %vm349_vm0, %v749_v34  ;;  %s344_s28 = scalar_lea.vmem %s866_s6, %s807_s9 }
  0x15   : > { %373 = vmatpush.msra.mxu0 %v368_v3  ;;  %v393_v7 = vmul.f32 2.0, %v391_v5  ;;  %v411_v11 = vld [vmem:[%s330_s15] sm:$0xff] }
  0x16   : > { %v355_v19 = vld [vmem:[#allocation6] sm:$0xff] }
  0x17   : > { %374 = vmatpush.msra.mxu0 %v367_v4  ;;  %397 = vperm.xlu0 %682, %v393_v7   ;;  %v354_v20 = vld [vmem:[%s326_s18] sm:$0xff] }
  0x18   : > { %v684_v25 = vld [vmem:[%s864_s4] ss:$0 sm:$0xff] }
  0x19   : > { %375 = vmatpush.msra.mxu0 %v366_v6  ;;  %v685_v56 = vld [vmem:[%s865_s5] ss:$0 sm:$0xff] }
  0x1a   : > { %v475_v36 = vld [vmem:[#allocation2] sm:$0xff] }
  0x1b   : > { %376 = vmatpush.msra.mxu0 %v365_v8  ;;  %v484_v42 = vld [vmem:[#allocation3] sm:$0xff]  ;;  %v477_v8 = vld [vmem:[#allocation4] sm:$0xff] }
  0x1d   : > { %377 = vmatpush.msra.mxu0 %v364_v9 }
  0x1f   : > { %378 = vmatpush.msra.mxu0 %v363_v10  ;;  %414 = vperm.xlu0 %682, %v411_v11   ;;  %v486_v11 = vld [vmem:[#allocation5] sm:$0xff] }
  0x21   : > { %379 = vmatpush.msra.mxu0 %v362_v12 }
  0x23   : > { %380 = vmatpush.msra.mxu0 %v361_v13 }
  0x25   : > { %381 = vmatpush.msra.mxu0 %v360_v14 }
  0x27   : > { %382 = vmatpush.msra.mxu0 %v359_v15 }
  0x29   : > { %383 = vmatpush.msra.mxu0 %v358_v16 }
  0x2b   : > { %384 = vmatpush.msra.mxu0 %v357_v17 }
  0x2d   : > { %385 = vmatpush.msra.mxu0 %v356_v18 }
  0x2f   : > { %386 = vmatpush.msra.mxu0 %v355_v19 }
  0x30   : > { %387 = vmatmul.f32.vlgmr.msra.gmra.mxu0 %v354_v20 }
  0x89   : > { %v398_v22 = vpop.permute.xlu0 %397 }
  0x91   : > { %v415_v26 = vpop.permute.xlu0 %414 }
  0x92   : > { %vm417_vm2 = vcmp.eq.s32.totalorder %v415_v26, %v684_v25 }
  0x93   : > { %v639_v32 = vsel %vm417_vm2, 1.0, %v748_v21 }
  0xad   : > { %v388_v27 = vpop.f32.mrf.mxu0 }
  0xae   : > { %v394_v28 = vmul.f32 2.0, %v388_v27 }
  0xb0   : > { %v400_v30 = vsub.f32 %v398_v22, %v394_v28 }
  0xb2   : > { %v426_v31 = vmul.f32 %v638_v29, %v400_v30 }
  0xb4   : > { %v429_v33 = vmul.f32 %v639_v32, %v426_v31 }
  0xb6   : > { %431 = vmax.xlane.f32.xlu1 %v429_v33  ;;  %v430_v35 = vsub.f32 %v426_v31, %v429_v33 }
  0xbe   : > { %453 = vmax.xlane.f32.xlu1 %v430_v35 }
  0xd7   : > { %406 = vperm.xlu1 %683, %v391_v5  }
 0x129   : > { %v432_v37 = vpop.xlane.xlu1 %431 }
 0x12a   : > { %vm433_vm3 = vcmp.eq.f32.partialorder %v429_v33, %v432_v37  ;;  %vm476_vm4 = vcmp.gt.f32.partialorder %v432_v37, %v475_v36 }
 0x12b   : > { %v482_v38 = vsel %vm476_vm4, %v432_v37, %v475_v36  ;;  %v434_v39 = vsel %vm433_vm3, %v823_v24, 128 }
 0x12c   : > { %483 = vst.msk [vmem:[#allocation2] sm:$0xff] %vm349_vm0, %v482_v38  ;;  %v436_v40 = vshra.s32 %v434_v39, 16  ;;  %v435_v48 = vand.u32 65535, %v434_v39 }
 0x12e   : > { %v438_v41 = vcvt.s32.f32 %v436_v40  ;;  %v437_v50 = vcvt.s32.f32 %v435_v48 }
 0x130   : > { %439 = vmin.xlane.f32.xlu2 %v438_v41 }
 0x131   : > { %v454_v43 = vpop.xlane.xlu1 %453 }
 0x132   : > { %vm455_vm5 = vcmp.eq.f32.partialorder %v430_v35, %v454_v43  ;;  %vm485_vm6 = vcmp.gt.f32.partialorder %v454_v43, %v484_v42 }
 0x133   : > { %v490_v44 = vsel %vm485_vm6, %v454_v43, %v484_v42  ;;  %v456_v45 = vsel %vm455_vm5, %v823_v24, 128 }
 0x134   : > { %491 = vst.msk [vmem:[#allocation3] sm:$0xff] %vm349_vm0, %v490_v44  ;;  %v458_v46 = vshra.s32 %v456_v45, 16  ;;  %v457_v52 = vand.u32 65535, %v456_v45 }
 0x136   : > { %v460_v47 = vcvt.s32.f32 %v458_v46  ;;  %v459_v54 = vcvt.s32.f32 %v457_v52 }
 0x138   : > { %461 = vmin.xlane.f32.xlu2 %v460_v47 }
 0x149   : > { %v407_v57 = vpop.permute.xlu1 %406 }
 0x14a   : > { %v409_v59 = vsub.f32 %v685_v56, %v407_v57 }
 0x14c   : > { %v410_v0 = vadd.f32 %v409_v59, %v400_v30 }
 0x1a3   : > { %v440_v49 = vpop.xlane.xlu2 %439 }
 0x1a4   : > { %vm441_vm7 = vcmp.eq.f32.partialorder %v438_v41, %v440_v49  ;;  %v446_v58 = vcvt.f32.s32 %v440_v49 }
 0x1a5   : > { %v442_v51 = vsel %vm441_vm7, %v437_v50, inf }
 0x1a6   : > { %443 = vmin.xlane.f32.xlu0 %v442_v51  ;;  %v447_v61 = vshll.u32 %v446_v58, 16 }
 0x1ab   : > { %v462_v53 = vpop.xlane.xlu2 %461 }
 0x1ac   : > { %vm463_vm8 = vcmp.eq.f32.partialorder %v460_v47, %v462_v53  ;;  %v468_v1 = vcvt.f32.s32 %v462_v53 }
 0x1ad   : > { %v464_v55 = vsel %vm463_vm8, %v459_v54, inf }
 0x1ae   : > { %465 = vmin.xlane.f32.xlu2 %v464_v55  ;;  %v469_v4 = vshll.u32 %v468_v1, 16 }
 0x219   : > { %v444_v60 = vpop.xlane.xlu0 %443 }
 0x21a   : > { %v445_v62 = vcvt.f32.s32 %v444_v60 }
 0x21c   : > { %v448_v63 = vadd.s32 %v447_v61, %v445_v62 }
 0x21e   : > { %vm449_vm9 = vcmp.eq.s32.totalorder %v823_v24, %v448_v63 }
 0x21f   : > { %v450_v2 = vsel %vm449_vm9, %v410_v0, 0.0 }
 0x220   : > { %451 = vadd.xlane.f32.xlu2 %v450_v2 }
 0x221   : > { %v466_v3 = vpop.xlane.xlu2 %465 }
 0x222   : > { %v467_v5 = vcvt.f32.s32 %v466_v3 }
 0x224   : > { %v470_v6 = vadd.s32 %v469_v4, %v467_v5 }
 0x226   : > { %vm471_vm10 = vcmp.eq.s32.totalorder %v823_v24, %v470_v6 }
 0x227   : > { %v472_v7 = vsel %vm471_vm10, %v410_v0, 0.0 }
 0x228   : > { %473 = vadd.xlane.f32.xlu2 %v472_v7 }
 0x293   : > { %v452_v9 = vpop.xlane.xlu2 %451 }
 0x294   : > { %v478_v10 = vsel %vm476_vm4, %v452_v9, %v477_v8 }
 0x295   : > { %480 = vst.msk [vmem:[#allocation4] sm:$0xff] %vm349_vm0, %v478_v10 }
 0x29b   : > { %v474_v12 = vpop.xlane.xlu2 %473 }
 0x29c   : > { %v487_v13 = vsel %vm485_vm6, %v474_v12, %v486_v11  ;;  %v495_v14 = vld [vmem:[#allocation4] sm:$0xff] }
 0x29d   : > { %488 = vst.msk [vmem:[#allocation5] sm:$0xff] %vm349_vm0, %v487_v13  ;;  %v496_v15 = vsub.f32 1.0, %v495_v14 }
 0x2a4   : > { %v497_v16 = vld [vmem:[#allocation5] sm:$0xff] }
 0x2a5   : > { %v498_v17 = vadd.f32 %v497_v16, %v496_v15 }
 0x2a7   : > { %v499_v18 = vmax.f32 %v498_v17, 0.0 }
 0x2a9   : > { %500 = vst.msk [vmem:[%s344_s28] sm:$0xff] %vm349_vm0, %v499_v18 }
 0x2aa PF: > { %s17_s23 = sadd.s32 1, %s742_s23   ;;  %s867_s21 = smov %s738_s22 }
 0x2ab   : > { %p14_p8 = scmp.ge.s32.totalorder %s17_s23, 4   ;;  %s868_s22 = smov %s870_s25 }
 0x2ad   :  { %16 = sbr.rel (!%p14_p8) target bundleno = 2 (0x2), region = 100 }
 0x2b2   :  { %520 = vsyncpa [#allocation7], 1 }
 0x2b3   :  { %522 = vsyncpa [#allocation7 + $0x1], 1 }

</bundles_post_ra>
